<compile_context>
chip_gen: v5e
topology: v5e:2x2
jax: 0.10.0
libtpu: 0.0.40
codegen_flags: <defaults>
</compile_context>

<pallas_src>
import math
import functools

import jax
import jax.numpy as jnp
from jax.experimental import pallas as pl
from jax.experimental.pallas import tpu as pltpu


def _round_up(n, m):
    return ((n + m - 1) // m) * m


def make_rnn_kernel(num_layers: int, seq_len: int, compute_dtype,
                    proj_chunk: int = 8):
    """Builds a Pallas kernel closed over static (num_layers, seq_len, dtype).

    Ref order (all VMEM):
      inputs : x(T, BT, Ip) compute_dtype,
               [W_ih^l.T (Ip_l, Hp), W_hh^l.T (Hp, Hp), bias^l (1, Hp)] * L,
               W_fc.T (Hp, Cp), b_fc (1, Cp)
      outputs: out (BT, Cp) f32
      scratch: xproj (T, BT, Hp) f32           -- hoisted input projection (+bias)
               seq   (T, BT, Hp) compute_dtype -- hidden sequence hand-off
    """
    n_in = 1 + 3 * num_layers + 2

    def kernel(*refs):
        x_ref = refs[0]
        fc_w_ref = refs[1 + 3 * num_layers]   # (Hp, Cp), compute_dtype
        fc_b_ref = refs[2 + 3 * num_layers]   # (1, Cp),  f32
        out_ref = refs[n_in]                  # (BT, Cp), f32
        xproj_ref = refs[n_in + 1]            # (T, BT, Hp) f32
        seq_ref = refs[n_in + 2]              # (T, BT, Hp) compute_dtype

        T, BT, Hp = xproj_ref.shape
        in_ref = x_ref                        # layer-0 input sequence
        h_last = None

        for l in range(num_layers):           # static unroll over layers
            wih_t = refs[1 + 3 * l][...]      # (I_l, Hp), compute_dtype
            whh_t = refs[2 + 3 * l][...]      # (Hp, Hp),  compute_dtype
            bias = refs[3 + 3 * l][...]       # (1, Hp) = b_ih + b_hh, f32
            i_l = in_ref.shape[-1]

            # Hoisted input projection, done in small T-chunks so no huge
            # (T*BT, I) temporary is materialized; one MXU dot per chunk.
            for t0 in range(0, seq_len, proj_chunk):
                tc = min(proj_chunk, seq_len - t0)
                x_chunk = in_ref[pl.ds(t0, tc)].astype(compute_dtype)
                proj = jnp.dot(x_chunk.reshape(tc * BT, i_l), wih_t,
                               preferred_element_type=jnp.float32) + bias
                xproj_ref[pl.ds(t0, tc)] = proj.reshape(tc, BT, Hp)

            last_layer = (l == num_layers - 1)

            # Serial recurrence: tanh(h @ W_hh.T + xproj[t]).  h is carried in
            # compute_dtype (single downcast at the tanh output); MXU
            # accumulation stays f32.
            def step(t, h, whh_t=whh_t, last_layer=last_layer):
                pre = jnp.dot(h, whh_t,
                              preferred_element_type=jnp.float32) + xproj_ref[t]
                h_new = jnp.tanh(pre).astype(compute_dtype)
                if not last_layer:            # last layer's sequence never read
                    seq_ref[t] = h_new
                return h_new

            h_last = jax.lax.fori_loop(
                0, seq_len, step,
                jnp.zeros((BT, Hp), compute_dtype),
                unroll=min(seq_len, 8))       # bounded unroll, not full
            in_ref = seq_ref                  # next layer consumes this layer

        out = (jnp.dot(h_last, fc_w_ref[...],
                       preferred_element_type=jnp.float32) + fc_b_ref[...])
        out_ref[...] = out.astype(out_ref.dtype)

    return kernel


def init_params(key, input_size, hidden_size, num_layers, num_classes):
    """Deterministic init matching the shapes of nn.RNN + nn.Linear."""
    stdv = 1.0 / math.sqrt(hidden_size)

    def u(k, shape, s):
        return jax.random.uniform(k, shape, jnp.float32, -s, s)

    layers = []
    for _ in range(num_layers):
        in_sz = input_size if not layers else hidden_size
        key, k1, k2, k3, k4 = jax.random.split(key, 5)
        layers.append(dict(
            w_ih=u(k1, (hidden_size, in_sz), stdv),
            w_hh=u(k2, (hidden_size, hidden_size), stdv),
            b_ih=u(k3, (hidden_size,), stdv),
            b_hh=u(k4, (hidden_size,), stdv),
        ))
    key, k1, k2 = jax.random.split(key, 3)
    fc_w = u(k1, (num_classes, hidden_size), stdv)
    fc_b = u(k2, (num_classes,), stdv)
    return dict(layers=layers, fc_w=fc_w, fc_b=fc_b)


def _vmem_capacity_bytes():
    """Per-generation physical VMEM, with a conservative (v7x) fallback."""
    try:
        info = pltpu.get_tpu_info()
        cap = int(getattr(info, "vmem_capacity_bytes", 0))
        if cap > 0:
            return cap
    except Exception:
        pass
    return 64 * 1024 * 1024


@functools.partial(jax.jit, static_argnames=("num_layers", "compute_dtype"))
def rnn_forward(x, params, *, num_layers, compute_dtype=jnp.float32):
    """x: (B, T, I) batch-first. Returns (B, num_classes) in float32."""
    B, T, I = x.shape
    H = params["layers"][0]["w_hh"].shape[0]
    C = params["fc_w"].shape[0]

    # Lane-dense padding: feature dims -> multiples of 128 lanes.
    Hp = _round_up(H, 128)
    Ip = _round_up(I, 128)
    Cp = _round_up(C, 128)

    cb = jnp.dtype(compute_dtype).itemsize
    sub = 16 if cb < 4 else 8              # bf16 packs 2 rows per sublane

    # ---- VMEM-budget-derived batch tile (instead of a hard 128 cap) ----
    vmem_cap = _vmem_capacity_bytes()
    budget = (vmem_cap * 3) // 4           # leave headroom vs. physical VMEM

    w_bytes = 0
    for l in range(num_layers):
        ip_l = Ip if l == 0 else Hp
        w_bytes += (ip_l * Hp + Hp * Hp) * cb + 8 * Hp * 4
    w_bytes += Hp * Cp * cb + 8 * Cp * 4
    fixed = 2 * w_bytes                    # pipeline double-buffers constants

    # per-batch-row cost: xproj(f32) + seq(compute) scratch, double-buffered x,
    # double-buffered output tile.
    per_row = T * Hp * (4 + cb) + 2 * T * Ip * cb + 2 * Cp * 4
    bt_fit = max(sub, ((budget - fixed) // max(per_row, 1)) // sub * sub)
    BT = int(min(_round_up(B, sub), bt_fit, 256))
    Bp = _round_up(B, BT)

    vmem_need = fixed + BT * per_row + (2 << 20)
    vmem_limit = int(max(min(max(vmem_need, 32 << 20), vmem_cap - (4 << 20)),
                         16 << 20))

    def pad2(a, r, c, dtype):
        a = a.astype(dtype)
        return jnp.pad(a, ((0, r - a.shape[0]), (0, c - a.shape[1])))

    # Time-major, zero-padded, pre-cast input: (T, Bp, Ip) in compute_dtype
    # (halves the per-grid-step HBM->VMEM DMA on the bf16 path).
    xt = jnp.transpose(x, (1, 0, 2)).astype(compute_dtype)
    xt = jnp.pad(xt, ((0, 0), (0, Bp - B), (0, Ip - I)))

    flat_inputs = [xt]
    in_specs = [pl.BlockSpec((T, BT, Ip), lambda b: (0, b, 0))]
    for l, lp in enumerate(params["layers"]):
        ip_l = Ip if l == 0 else Hp
        flat_inputs += [
            pad2(lp["w_ih"].T, ip_l, Hp, compute_dtype),
            pad2(lp["w_hh"].T, Hp, Hp, compute_dtype),
            pad2((lp["b_ih"] + lp["b_hh"]).reshape(1, H), 1, Hp, jnp.float32),
        ]
        in_specs += [
            pl.BlockSpec((ip_l, Hp), lambda b: (0, 0)),
            pl.BlockSpec((Hp, Hp), lambda b: (0, 0)),
            pl.BlockSpec((1, Hp), lambda b: (0, 0)),
        ]
    flat_inputs += [
        pad2(params["fc_w"].T, Hp, Cp, compute_dtype),
        pad2(params["fc_b"].reshape(1, C), 1, Cp, jnp.float32),
    ]
    in_specs += [
        pl.BlockSpec((Hp, Cp), lambda b: (0, 0)),
        pl.BlockSpec((1, Cp), lambda b: (0, 0)),
    ]

    kernel = make_rnn_kernel(num_layers, T, compute_dtype)
    out_p = pl.pallas_call(
        kernel,
        out_shape=jax.ShapeDtypeStruct((Bp, Cp), jnp.float32),
        grid=(Bp // BT,),
        in_specs=in_specs,
        out_specs=pl.BlockSpec((BT, Cp), lambda b: (b, 0)),
        scratch_shapes=[
            pltpu.VMEM((T, BT, Hp), jnp.float32),     # hoisted input projection
            pltpu.VMEM((T, BT, Hp), compute_dtype),   # layer hidden sequence
        ],
        compiler_params=pltpu.CompilerParams(
            dimension_semantics=("parallel",),        # batch tiles -> both TCs
            vmem_limit_bytes=vmem_limit,
        ),
    )(*flat_inputs)
    return out_p[:B, :C]


def rnn_forward_ref(x, params):
    """Pure-JAX f32 reference of the PyTorch forward for correctness checking."""
    B, T, _ = x.shape
    H = params["layers"][0]["w_hh"].shape[0]
    layer_in = x.astype(jnp.float32)
    h_last = None
    for lp in params["layers"]:
        h = jnp.zeros((B, H), jnp.float32)
        outs = []
        for t in range(T):
            h = jnp.tanh(layer_in[:, t, :] @ lp["w_ih"].T + lp["b_ih"]
                         + h @ lp["w_hh"].T + lp["b_hh"])
            outs.append(h)
        layer_in = jnp.stack(outs, axis=1)
        h_last = h
    return h_last @ params["fc_w"].T + params["fc_b"]


if __name__ == "__main__":
    # Small shapes consistent with the module's forward.
    B, T = 2, 8
    INPUT_SIZE, HIDDEN_SIZE, NUM_LAYERS, NUM_CLASSES = 16, 32, 2, 4

    key = jax.random.PRNGKey(0)
    kp, kx = jax.random.split(key)
    params = init_params(kp, INPUT_SIZE, HIDDEN_SIZE, NUM_LAYERS, NUM_CLASSES)
    x = jax.random.normal(kx, (B, T, INPUT_SIZE), jnp.float32)

    ref = rnn_forward_ref(x, params)

    # f32 path: exact-semantics check.
    out = jax.block_until_ready(rnn_forward(x, params, num_layers=NUM_LAYERS))
    assert out.shape == (B, NUM_CLASSES)
    assert jnp.allclose(out, ref, atol=2e-3, rtol=2e-3), (out, ref)

    # bf16-MXU path (v6e/v7x-oriented): weights, x, h carry and seq scratch in
    # bf16, f32 MXU accumulation and f32 tanh; looser tolerance for the
    # recurrent accumulation of bf16 rounding error.
    out_bf16 = jax.block_until_ready(
        rnn_forward(x, params, num_layers=NUM_LAYERS,
                    compute_dtype=jnp.bfloat16))
    assert jnp.allclose(out_bf16, ref, atol=5e-2, rtol=5e-2), (out_bf16, ref)

    print("KERNEL_OK")
</pallas_src>

<mosaic_0001>
module attributes {stable_mosaic.version = 11 : i64} {
  func.func @kernel(%arg0: i32, %arg1: memref<8x8x128xf32, #tpu.memory_space<vmem>>, %arg2: memref<128x128xf32, #tpu.memory_space<vmem>>, %arg3: memref<128x128xf32, #tpu.memory_space<vmem>>, %arg4: memref<1x128xf32, #tpu.memory_space<vmem>>, %arg5: memref<128x128xf32, #tpu.memory_space<vmem>>, %arg6: memref<128x128xf32, #tpu.memory_space<vmem>>, %arg7: memref<1x128xf32, #tpu.memory_space<vmem>>, %arg8: memref<128x128xf32, #tpu.memory_space<vmem>>, %arg9: memref<1x128xf32, #tpu.memory_space<vmem>>, %arg10: memref<8x128xf32, #tpu.memory_space<vmem>>, %arg11: memref<8x8x128xf32, #tpu.memory_space<vmem>>, %arg12: memref<8x8x128xf32, #tpu.memory_space<vmem>>) attributes {dimension_semantics = [#tpu.dimension_semantics<parallel>], iteration_bounds = array<i64: 1>, scalar_prefetch = 0 : i64, scratch_operands = 2 : i64, tpu.core_type = #tpu.core_type<tc>, window_params = [{transform_indices = @transform_0, window_bounds = array<i64: 8, 8, 128>}, {pipeline_mode = #tpu.pipeline_mode<synchronous>, transform_indices = @transform_1, window_bounds = array<i64: 128, 128>}, {pipeline_mode = #tpu.pipeline_mode<synchronous>, transform_indices = @transform_2, window_bounds = array<i64: 128, 128>}, {pipeline_mode = #tpu.pipeline_mode<synchronous>, transform_indices = @transform_3, window_bounds = array<i64: 1, 128>}, {pipeline_mode = #tpu.pipeline_mode<synchronous>, transform_indices = @transform_4, window_bounds = array<i64: 128, 128>}, {pipeline_mode = #tpu.pipeline_mode<synchronous>, transform_indices = @transform_5, window_bounds = array<i64: 128, 128>}, {pipeline_mode = #tpu.pipeline_mode<synchronous>, transform_indices = @transform_6, window_bounds = array<i64: 1, 128>}, {pipeline_mode = #tpu.pipeline_mode<synchronous>, transform_indices = @transform_7, window_bounds = array<i64: 128, 128>}, {pipeline_mode = #tpu.pipeline_mode<synchronous>, transform_indices = @transform_8, window_bounds = array<i64: 1, 128>}, {transform_indices = @transform_9, window_bounds = array<i64: 8, 128>}]} {
    %c0 = arith.constant 0 : index
    %c0_0 = arith.constant 0 : index
    %0 = vector.load %arg2[%c0, %c0_0] : memref<128x128xf32, #tpu.memory_space<vmem>>, vector<128x128xf32>
    %c0_1 = arith.constant 0 : index
    %c0_2 = arith.constant 0 : index
    %1 = vector.load %arg3[%c0_1, %c0_2] : memref<128x128xf32, #tpu.memory_space<vmem>>, vector<128x128xf32>
    %c0_3 = arith.constant 0 : index
    %c0_4 = arith.constant 0 : index
    %2 = vector.load %arg4[%c0_3, %c0_4] : memref<1x128xf32, #tpu.memory_space<vmem>>, vector<1x128xf32>
    %c0_5 = arith.constant 0 : index
    %c0_6 = arith.constant 0 : index
    %c0_7 = arith.constant 0 : index
    %3 = vector.load %arg1[%c0_5, %c0_6, %c0_7] : memref<8x8x128xf32, #tpu.memory_space<vmem>>, vector<8x8x128xf32>
    %4 = vector.shape_cast %3 : vector<8x8x128xf32> to vector<64x128xf32>
    %cst = arith.constant dense<0.000000e+00> : vector<64x128xf32>
    %5 = tpu.matmul %4, %0, %cst {dimension_numbers = #tpu.dot_dimension_numbers<[1], [0], [0], [1], [0, 0, 1, 1], [], []>} : vector<64x128xf32>, vector<128x128xf32>, vector<64x128xf32> -> vector<64x128xf32>
    %6 = vector.broadcast %2 : vector<1x128xf32> to vector<64x128xf32>
    %7 = arith.addf %5, %6 : vector<64x128xf32>
    %8 = vector.shape_cast %7 : vector<64x128xf32> to vector<8x8x128xf32>
    %c0_8 = arith.constant 0 : index
    %c0_9 = arith.constant 0 : index
    %c0_10 = arith.constant 0 : index
    %9 = vector.load %arg11[%c0_8, %c0_9, %c0_10] : memref<8x8x128xf32, #tpu.memory_space<vmem>>, vector<8x8x128xf32>
    tpu.vector_store %arg11[%c0_8, %c0_9, %c0_10], %8 {strides = array<i32>} : memref<8x8x128xf32, #tpu.memory_space<vmem>>, vector<8x8x128xf32>,
    %cst_11 = arith.constant 0.000000e+00 : f32
    %10 = vector.broadcast %cst_11 : f32 to vector<8x128xf32>
    %c0_i32 = arith.constant 0 : i32
    %cst_12 = arith.constant dense<0.000000e+00> : vector<8x128xf32>
    %11 = tpu.matmul %10, %1, %cst_12 {dimension_numbers = #tpu.dot_dimension_numbers<[1], [0], [0], [1], [0, 0, 1, 1], [], []>} : vector<8x128xf32>, vector<128x128xf32>, vector<8x128xf32> -> vector<8x128xf32>
    %12 = arith.index_cast %c0_i32 : i32 to index
    %c0_13 = arith.constant 0 : index
    %c0_14 = arith.constant 0 : index
    %13 = vector.load %arg11[%12, %c0_13, %c0_14] : memref<8x8x128xf32, #tpu.memory_space<vmem>>, vector<1x8x128xf32>
    %14 = vector.shape_cast %13 : vector<1x8x128xf32> to vector<8x128xf32>
    %15 = arith.addf %11, %14 : vector<8x128xf32>
    %16 = math.tanh %15 : vector<8x128xf32>
    %17 = arith.index_cast %c0_i32 : i32 to index
    %c0_15 = arith.constant 0 : index
    %c0_16 = arith.constant 0 : index
    %18 = vector.load %arg12[%17, %c0_15, %c0_16] : memref<8x8x128xf32, #tpu.memory_space<vmem>>, vector<1x8x128xf32>
    %19 = vector.shape_cast %18 : vector<1x8x128xf32> to vector<8x128xf32>
    %20 = vector.shape_cast %16 : vector<8x128xf32> to vector<1x8x128xf32>
    tpu.vector_store %arg12[%17, %c0_15, %c0_16], %20 {strides = array<i32>} : memref<8x8x128xf32, #tpu.memory_space<vmem>>, vector<1x8x128xf32>,
    %c1_i32 = arith.constant 1 : i32
    %cst_17 = arith.constant dense<0.000000e+00> : vector<8x128xf32>
    %21 = tpu.matmul %16, %1, %cst_17 {dimension_numbers = #tpu.dot_dimension_numbers<[1], [0], [0], [1], [0, 0, 1, 1], [], []>} : vector<8x128xf32>, vector<128x128xf32>, vector<8x128xf32> -> vector<8x128xf32>
    %22 = arith.index_cast %c1_i32 : i32 to index
    %c0_18 = arith.constant 0 : index
    %c0_19 = arith.constant 0 : index
    %23 = vector.load %arg11[%22, %c0_18, %c0_19] : memref<8x8x128xf32, #tpu.memory_space<vmem>>, vector<1x8x128xf32>
    %24 = vector.shape_cast %23 : vector<1x8x128xf32> to vector<8x128xf32>
    %25 = arith.addf %21, %24 : vector<8x128xf32>
    %26 = math.tanh %25 : vector<8x128xf32>
    %27 = arith.index_cast %c1_i32 : i32 to index
    %c0_20 = arith.constant 0 : index
    %c0_21 = arith.constant 0 : index
    %28 = vector.load %arg12[%27, %c0_20, %c0_21] : memref<8x8x128xf32, #tpu.memory_space<vmem>>, vector<1x8x128xf32>
    %29 = vector.shape_cast %28 : vector<1x8x128xf32> to vector<8x128xf32>
    %30 = vector.shape_cast %26 : vector<8x128xf32> to vector<1x8x128xf32>
    tpu.vector_store %arg12[%27, %c0_20, %c0_21], %30 {strides = array<i32>} : memref<8x8x128xf32, #tpu.memory_space<vmem>>, vector<1x8x128xf32>,
    %c2_i32 = arith.constant 2 : i32
    %cst_22 = arith.constant dense<0.000000e+00> : vector<8x128xf32>
    %31 = tpu.matmul %26, %1, %cst_22 {dimension_numbers = #tpu.dot_dimension_numbers<[1], [0], [0], [1], [0, 0, 1, 1], [], []>} : vector<8x128xf32>, vector<128x128xf32>, vector<8x128xf32> -> vector<8x128xf32>
    %32 = arith.index_cast %c2_i32 : i32 to index
    %c0_23 = arith.constant 0 : index
    %c0_24 = arith.constant 0 : index
    %33 = vector.load %arg11[%32, %c0_23, %c0_24] : memref<8x8x128xf32, #tpu.memory_space<vmem>>, vector<1x8x128xf32>
    %34 = vector.shape_cast %33 : vector<1x8x128xf32> to vector<8x128xf32>
    %35 = arith.addf %31, %34 : vector<8x128xf32>
    %36 = math.tanh %35 : vector<8x128xf32>
    %37 = arith.index_cast %c2_i32 : i32 to index
    %c0_25 = arith.constant 0 : index
    %c0_26 = arith.constant 0 : index
    %38 = vector.load %arg12[%37, %c0_25, %c0_26] : memref<8x8x128xf32, #tpu.memory_space<vmem>>, vector<1x8x128xf32>
    %39 = vector.shape_cast %38 : vector<1x8x128xf32> to vector<8x128xf32>
    %40 = vector.shape_cast %36 : vector<8x128xf32> to vector<1x8x128xf32>
    tpu.vector_store %arg12[%37, %c0_25, %c0_26], %40 {strides = array<i32>} : memref<8x8x128xf32, #tpu.memory_space<vmem>>, vector<1x8x128xf32>,
    %c3_i32 = arith.constant 3 : i32
    %cst_27 = arith.constant dense<0.000000e+00> : vector<8x128xf32>
    %41 = tpu.matmul %36, %1, %cst_27 {dimension_numbers = #tpu.dot_dimension_numbers<[1], [0], [0], [1], [0, 0, 1, 1], [], []>} : vector<8x128xf32>, vector<128x128xf32>, vector<8x128xf32> -> vector<8x128xf32>
    %42 = arith.index_cast %c3_i32 : i32 to index
    %c0_28 = arith.constant 0 : index
    %c0_29 = arith.constant 0 : index
    %43 = vector.load %arg11[%42, %c0_28, %c0_29] : memref<8x8x128xf32, #tpu.memory_space<vmem>>, vector<1x8x128xf32>
    %44 = vector.shape_cast %43 : vector<1x8x128xf32> to vector<8x128xf32>
    %45 = arith.addf %41, %44 : vector<8x128xf32>
    %46 = math.tanh %45 : vector<8x128xf32>
    %47 = arith.index_cast %c3_i32 : i32 to index
    %c0_30 = arith.constant 0 : index
    %c0_31 = arith.constant 0 : index
    %48 = vector.load %arg12[%47, %c0_30, %c0_31] : memref<8x8x128xf32, #tpu.memory_space<vmem>>, vector<1x8x128xf32>
    %49 = vector.shape_cast %48 : vector<1x8x128xf32> to vector<8x128xf32>
    %50 = vector.shape_cast %46 : vector<8x128xf32> to vector<1x8x128xf32>
    tpu.vector_store %arg12[%47, %c0_30, %c0_31], %50 {strides = array<i32>} : memref<8x8x128xf32, #tpu.memory_space<vmem>>, vector<1x8x128xf32>,
    %c4_i32 = arith.constant 4 : i32
    %cst_32 = arith.constant dense<0.000000e+00> : vector<8x128xf32>
    %51 = tpu.matmul %46, %1, %cst_32 {dimension_numbers = #tpu.dot_dimension_numbers<[1], [0], [0], [1], [0, 0, 1, 1], [], []>} : vector<8x128xf32>, vector<128x128xf32>, vector<8x128xf32> -> vector<8x128xf32>
    %52 = arith.index_cast %c4_i32 : i32 to index
    %c0_33 = arith.constant 0 : index
    %c0_34 = arith.constant 0 : index
    %53 = vector.load %arg11[%52, %c0_33, %c0_34] : memref<8x8x128xf32, #tpu.memory_space<vmem>>, vector<1x8x128xf32>
    %54 = vector.shape_cast %53 : vector<1x8x128xf32> to vector<8x128xf32>
    %55 = arith.addf %51, %54 : vector<8x128xf32>
    %56 = math.tanh %55 : vector<8x128xf32>
    %57 = arith.index_cast %c4_i32 : i32 to index
    %c0_35 = arith.constant 0 : index
    %c0_36 = arith.constant 0 : index
    %58 = vector.load %arg12[%57, %c0_35, %c0_36] : memref<8x8x128xf32, #tpu.memory_space<vmem>>, vector<1x8x128xf32>
    %59 = vector.shape_cast %58 : vector<1x8x128xf32> to vector<8x128xf32>
    %60 = vector.shape_cast %56 : vector<8x128xf32> to vector<1x8x128xf32>
    tpu.vector_store %arg12[%57, %c0_35, %c0_36], %60 {strides = array<i32>} : memref<8x8x128xf32, #tpu.memory_space<vmem>>, vector<1x8x128xf32>,
    %c5_i32 = arith.constant 5 : i32
    %cst_37 = arith.constant dense<0.000000e+00> : vector<8x128xf32>
    %61 = tpu.matmul %56, %1, %cst_37 {dimension_numbers = #tpu.dot_dimension_numbers<[1], [0], [0], [1], [0, 0, 1, 1], [], []>} : vector<8x128xf32>, vector<128x128xf32>, vector<8x128xf32> -> vector<8x128xf32>
    %62 = arith.index_cast %c5_i32 : i32 to index
    %c0_38 = arith.constant 0 : index
    %c0_39 = arith.constant 0 : index
    %63 = vector.load %arg11[%62, %c0_38, %c0_39] : memref<8x8x128xf32, #tpu.memory_space<vmem>>, vector<1x8x128xf32>
    %64 = vector.shape_cast %63 : vector<1x8x128xf32> to vector<8x128xf32>
    %65 = arith.addf %61, %64 : vector<8x128xf32>
    %66 = math.tanh %65 : vector<8x128xf32>
    %67 = arith.index_cast %c5_i32 : i32 to index
    %c0_40 = arith.constant 0 : index
    %c0_41 = arith.constant 0 : index
    %68 = vector.load %arg12[%67, %c0_40, %c0_41] : memref<8x8x128xf32, #tpu.memory_space<vmem>>, vector<1x8x128xf32>
    %69 = vector.shape_cast %68 : vector<1x8x128xf32> to vector<8x128xf32>
    %70 = vector.shape_cast %66 : vector<8x128xf32> to vector<1x8x128xf32>
    tpu.vector_store %arg12[%67, %c0_40, %c0_41], %70 {strides = array<i32>} : memref<8x8x128xf32, #tpu.memory_space<vmem>>, vector<1x8x128xf32>,
    %c6_i32 = arith.constant 6 : i32
    %cst_42 = arith.constant dense<0.000000e+00> : vector<8x128xf32>
    %71 = tpu.matmul %66, %1, %cst_42 {dimension_numbers = #tpu.dot_dimension_numbers<[1], [0], [0], [1], [0, 0, 1, 1], [], []>} : vector<8x128xf32>, vector<128x128xf32>, vector<8x128xf32> -> vector<8x128xf32>
    %72 = arith.index_cast %c6_i32 : i32 to index
    %c0_43 = arith.constant 0 : index
    %c0_44 = arith.constant 0 : index
    %73 = vector.load %arg11[%72, %c0_43, %c0_44] : memref<8x8x128xf32, #tpu.memory_space<vmem>>, vector<1x8x128xf32>
    %74 = vector.shape_cast %73 : vector<1x8x128xf32> to vector<8x128xf32>
    %75 = arith.addf %71, %74 : vector<8x128xf32>
    %76 = math.tanh %75 : vector<8x128xf32>
    %77 = arith.index_cast %c6_i32 : i32 to index
    %c0_45 = arith.constant 0 : index
    %c0_46 = arith.constant 0 : index
    %78 = vector.load %arg12[%77, %c0_45, %c0_46] : memref<8x8x128xf32, #tpu.memory_space<vmem>>, vector<1x8x128xf32>
    %79 = vector.shape_cast %78 : vector<1x8x128xf32> to vector<8x128xf32>
    %80 = vector.shape_cast %76 : vector<8x128xf32> to vector<1x8x128xf32>
    tpu.vector_store %arg12[%77, %c0_45, %c0_46], %80 {strides = array<i32>} : memref<8x8x128xf32, #tpu.memory_space<vmem>>, vector<1x8x128xf32>,
    %c7_i32 = arith.constant 7 : i32
    %cst_47 = arith.constant dense<0.000000e+00> : vector<8x128xf32>
    %81 = tpu.matmul %76, %1, %cst_47 {dimension_numbers = #tpu.dot_dimension_numbers<[1], [0], [0], [1], [0, 0, 1, 1], [], []>} : vector<8x128xf32>, vector<128x128xf32>, vector<8x128xf32> -> vector<8x128xf32>
    %82 = arith.index_cast %c7_i32 : i32 to index
    %c0_48 = arith.constant 0 : index
    %c0_49 = arith.constant 0 : index
    %83 = vector.load %arg11[%82, %c0_48, %c0_49] : memref<8x8x128xf32, #tpu.memory_space<vmem>>, vector<1x8x128xf32>
    %84 = vector.shape_cast %83 : vector<1x8x128xf32> to vector<8x128xf32>
    %85 = arith.addf %81, %84 : vector<8x128xf32>
    %86 = math.tanh %85 : vector<8x128xf32>
    %87 = arith.index_cast %c7_i32 : i32 to index
    %c0_50 = arith.constant 0 : index
    %c0_51 = arith.constant 0 : index
    %88 = vector.load %arg12[%87, %c0_50, %c0_51] : memref<8x8x128xf32, #tpu.memory_space<vmem>>, vector<1x8x128xf32>
    %89 = vector.shape_cast %88 : vector<1x8x128xf32> to vector<8x128xf32>
    %90 = vector.shape_cast %86 : vector<8x128xf32> to vector<1x8x128xf32>
    tpu.vector_store %arg12[%87, %c0_50, %c0_51], %90 {strides = array<i32>} : memref<8x8x128xf32, #tpu.memory_space<vmem>>, vector<1x8x128xf32>,
    %c8_i32 = arith.constant 8 : i32
    %c0_52 = arith.constant 0 : index
    %c0_53 = arith.constant 0 : index
    %91 = vector.load %arg5[%c0_52, %c0_53] : memref<128x128xf32, #tpu.memory_space<vmem>>, vector<128x128xf32>
    %c0_54 = arith.constant 0 : index
    %c0_55 = arith.constant 0 : index
    %92 = vector.load %arg6[%c0_54, %c0_55] : memref<128x128xf32, #tpu.memory_space<vmem>>, vector<128x128xf32>
    %c0_56 = arith.constant 0 : index
    %c0_57 = arith.constant 0 : index
    %93 = vector.load %arg7[%c0_56, %c0_57] : memref<1x128xf32, #tpu.memory_space<vmem>>, vector<1x128xf32>
    %c0_58 = arith.constant 0 : index
    %c0_59 = arith.constant 0 : index
    %c0_60 = arith.constant 0 : index
    %94 = vector.load %arg12[%c0_58, %c0_59, %c0_60] : memref<8x8x128xf32, #tpu.memory_space<vmem>>, vector<8x8x128xf32>
    %95 = vector.shape_cast %94 : vector<8x8x128xf32> to vector<64x128xf32>
    %cst_61 = arith.constant dense<0.000000e+00> : vector<64x128xf32>
    %96 = tpu.matmul %95, %91, %cst_61 {dimension_numbers = #tpu.dot_dimension_numbers<[1], [0], [0], [1], [0, 0, 1, 1], [], []>} : vector<64x128xf32>, vector<128x128xf32>, vector<64x128xf32> -> vector<64x128xf32>
    %97 = vector.broadcast %93 : vector<1x128xf32> to vector<64x128xf32>
    %98 = arith.addf %96, %97 : vector<64x128xf32>
    %99 = vector.shape_cast %98 : vector<64x128xf32> to vector<8x8x128xf32>
    %c0_62 = arith.constant 0 : index
    %c0_63 = arith.constant 0 : index
    %c0_64 = arith.constant 0 : index
    %100 = vector.load %arg11[%c0_62, %c0_63, %c0_64] : memref<8x8x128xf32, #tpu.memory_space<vmem>>, vector<8x8x128xf32>
    tpu.vector_store %arg11[%c0_62, %c0_63, %c0_64], %99 {strides = array<i32>} : memref<8x8x128xf32, #tpu.memory_space<vmem>>, vector<8x8x128xf32>,
    %cst_65 = arith.constant 0.000000e+00 : f32
    %101 = vector.broadcast %cst_65 : f32 to vector<8x128xf32>
    %c0_i32_66 = arith.constant 0 : i32
    %cst_67 = arith.constant dense<0.000000e+00> : vector<8x128xf32>
    %102 = tpu.matmul %101, %92, %cst_67 {dimension_numbers = #tpu.dot_dimension_numbers<[1], [0], [0], [1], [0, 0, 1, 1], [], []>} : vector<8x128xf32>, vector<128x128xf32>, vector<8x128xf32> -> vector<8x128xf32>
    %103 = arith.index_cast %c0_i32_66 : i32 to index
    %c0_68 = arith.constant 0 : index
    %c0_69 = arith.constant 0 : index
    %104 = vector.load %arg11[%103, %c0_68, %c0_69] : memref<8x8x128xf32, #tpu.memory_space<vmem>>, vector<1x8x128xf32>
    %105 = vector.shape_cast %104 : vector<1x8x128xf32> to vector<8x128xf32>
    %106 = arith.addf %102, %105 : vector<8x128xf32>
    %107 = math.tanh %106 : vector<8x128xf32>
    %c1_i32_70 = arith.constant 1 : i32
    %cst_71 = arith.constant dense<0.000000e+00> : vector<8x128xf32>
    %108 = tpu.matmul %107, %92, %cst_71 {dimension_numbers = #tpu.dot_dimension_numbers<[1], [0], [0], [1], [0, 0, 1, 1], [], []>} : vector<8x128xf32>, vector<128x128xf32>, vector<8x128xf32> -> vector<8x128xf32>
    %109 = arith.index_cast %c1_i32_70 : i32 to index
    %c0_72 = arith.constant 0 : index
    %c0_73 = arith.constant 0 : index
    %110 = vector.load %arg11[%109, %c0_72, %c0_73] : memref<8x8x128xf32, #tpu.memory_space<vmem>>, vector<1x8x128xf32>
    %111 = vector.shape_cast %110 : vector<1x8x128xf32> to vector<8x128xf32>
    %112 = arith.addf %108, %111 : vector<8x128xf32>
    %113 = math.tanh %112 : vector<8x128xf32>
    %c2_i32_74 = arith.constant 2 : i32
    %cst_75 = arith.constant dense<0.000000e+00> : vector<8x128xf32>
    %114 = tpu.matmul %113, %92, %cst_75 {dimension_numbers = #tpu.dot_dimension_numbers<[1], [0], [0], [1], [0, 0, 1, 1], [], []>} : vector<8x128xf32>, vector<128x128xf32>, vector<8x128xf32> -> vector<8x128xf32>
    %115 = arith.index_cast %c2_i32_74 : i32 to index
    %c0_76 = arith.constant 0 : index
    %c0_77 = arith.constant 0 : index
    %116 = vector.load %arg11[%115, %c0_76, %c0_77] : memref<8x8x128xf32, #tpu.memory_space<vmem>>, vector<1x8x128xf32>
    %117 = vector.shape_cast %116 : vector<1x8x128xf32> to vector<8x128xf32>
    %118 = arith.addf %114, %117 : vector<8x128xf32>
    %119 = math.tanh %118 : vector<8x128xf32>
    %c3_i32_78 = arith.constant 3 : i32
    %cst_79 = arith.constant dense<0.000000e+00> : vector<8x128xf32>
    %120 = tpu.matmul %119, %92, %cst_79 {dimension_numbers = #tpu.dot_dimension_numbers<[1], [0], [0], [1], [0, 0, 1, 1], [], []>} : vector<8x128xf32>, vector<128x128xf32>, vector<8x128xf32> -> vector<8x128xf32>
    %121 = arith.index_cast %c3_i32_78 : i32 to index
    %c0_80 = arith.constant 0 : index
    %c0_81 = arith.constant 0 : index
    %122 = vector.load %arg11[%121, %c0_80, %c0_81] : memref<8x8x128xf32, #tpu.memory_space<vmem>>, vector<1x8x128xf32>
    %123 = vector.shape_cast %122 : vector<1x8x128xf32> to vector<8x128xf32>
    %124 = arith.addf %120, %123 : vector<8x128xf32>
    %125 = math.tanh %124 : vector<8x128xf32>
    %c4_i32_82 = arith.constant 4 : i32
    %cst_83 = arith.constant dense<0.000000e+00> : vector<8x128xf32>
    %126 = tpu.matmul %125, %92, %cst_83 {dimension_numbers = #tpu.dot_dimension_numbers<[1], [0], [0], [1], [0, 0, 1, 1], [], []>} : vector<8x128xf32>, vector<128x128xf32>, vector<8x128xf32> -> vector<8x128xf32>
    %127 = arith.index_cast %c4_i32_82 : i32 to index
    %c0_84 = arith.constant 0 : index
    %c0_85 = arith.constant 0 : index
    %128 = vector.load %arg11[%127, %c0_84, %c0_85] : memref<8x8x128xf32, #tpu.memory_space<vmem>>, vector<1x8x128xf32>
    %129 = vector.shape_cast %128 : vector<1x8x128xf32> to vector<8x128xf32>
    %130 = arith.addf %126, %129 : vector<8x128xf32>
    %131 = math.tanh %130 : vector<8x128xf32>
    %c5_i32_86 = arith.constant 5 : i32
    %cst_87 = arith.constant dense<0.000000e+00> : vector<8x128xf32>
    %132 = tpu.matmul %131, %92, %cst_87 {dimension_numbers = #tpu.dot_dimension_numbers<[1], [0], [0], [1], [0, 0, 1, 1], [], []>} : vector<8x128xf32>, vector<128x128xf32>, vector<8x128xf32> -> vector<8x128xf32>
    %133 = arith.index_cast %c5_i32_86 : i32 to index
    %c0_88 = arith.constant 0 : index
    %c0_89 = arith.constant 0 : index
    %134 = vector.load %arg11[%133, %c0_88, %c0_89] : memref<8x8x128xf32, #tpu.memory_space<vmem>>, vector<1x8x128xf32>
    %135 = vector.shape_cast %134 : vector<1x8x128xf32> to vector<8x128xf32>
    %136 = arith.addf %132, %135 : vector<8x128xf32>
    %137 = math.tanh %136 : vector<8x128xf32>
    %c6_i32_90 = arith.constant 6 : i32
    %cst_91 = arith.constant dense<0.000000e+00> : vector<8x128xf32>
    %138 = tpu.matmul %137, %92, %cst_91 {dimension_numbers = #tpu.dot_dimension_numbers<[1], [0], [0], [1], [0, 0, 1, 1], [], []>} : vector<8x128xf32>, vector<128x128xf32>, vector<8x128xf32> -> vector<8x128xf32>
    %139 = arith.index_cast %c6_i32_90 : i32 to index
    %c0_92 = arith.constant 0 : index
    %c0_93 = arith.constant 0 : index
    %140 = vector.load %arg11[%139, %c0_92, %c0_93] : memref<8x8x128xf32, #tpu.memory_space<vmem>>, vector<1x8x128xf32>
    %141 = vector.shape_cast %140 : vector<1x8x128xf32> to vector<8x128xf32>
    %142 = arith.addf %138, %141 : vector<8x128xf32>
    %143 = math.tanh %142 : vector<8x128xf32>
    %c7_i32_94 = arith.constant 7 : i32
    %cst_95 = arith.constant dense<0.000000e+00> : vector<8x128xf32>
    %144 = tpu.matmul %143, %92, %cst_95 {dimension_numbers = #tpu.dot_dimension_numbers<[1], [0], [0], [1], [0, 0, 1, 1], [], []>} : vector<8x128xf32>, vector<128x128xf32>, vector<8x128xf32> -> vector<8x128xf32>
    %145 = arith.index_cast %c7_i32_94 : i32 to index
    %c0_96 = arith.constant 0 : index
    %c0_97 = arith.constant 0 : index
    %146 = vector.load %arg11[%145, %c0_96, %c0_97] : memref<8x8x128xf32, #tpu.memory_space<vmem>>, vector<1x8x128xf32>
    %147 = vector.shape_cast %146 : vector<1x8x128xf32> to vector<8x128xf32>
    %148 = arith.addf %144, %147 : vector<8x128xf32>
    %149 = math.tanh %148 : vector<8x128xf32>
    %c8_i32_98 = arith.constant 8 : i32
    %c0_99 = arith.constant 0 : index
    %c0_100 = arith.constant 0 : index
    %150 = vector.load %arg8[%c0_99, %c0_100] : memref<128x128xf32, #tpu.memory_space<vmem>>, vector<128x128xf32>
    %cst_101 = arith.constant dense<0.000000e+00> : vector<8x128xf32>
    %151 = tpu.matmul %149, %150, %cst_101 {dimension_numbers = #tpu.dot_dimension_numbers<[1], [0], [0], [1], [0, 0, 1, 1], [], []>} : vector<8x128xf32>, vector<128x128xf32>, vector<8x128xf32> -> vector<8x128xf32>
    %c0_102 = arith.constant 0 : index
    %c0_103 = arith.constant 0 : index
    %152 = vector.load %arg9[%c0_102, %c0_103] : memref<1x128xf32, #tpu.memory_space<vmem>>, vector<1x128xf32>
    %153 = vector.broadcast %152 : vector<1x128xf32> to vector<8x128xf32>
    %154 = arith.addf %151, %153 : vector<8x128xf32>
    %c0_104 = arith.constant 0 : index
    %c0_105 = arith.constant 0 : index
    %155 = vector.load %arg10[%c0_104, %c0_105] : memref<8x128xf32, #tpu.memory_space<vmem>>, vector<8x128xf32>
    tpu.vector_store %arg10[%c0_104, %c0_105], %154 {strides = array<i32>} : memref<8x128xf32, #tpu.memory_space<vmem>>, vector<8x128xf32>,
    return
  }
  func.func @transform_0(%arg0: i32) -> (i32, i32, i32) {
    %c0_i32 = arith.constant 0 : i32
    %c0_i32_0 = arith.constant 0 : i32
    %c0_i32_1 = arith.constant 0 : i32
    return %c0_i32, %arg0, %c0_i32_0 : i32, i32, i32
  }
  func.func @transform_1(%arg0: i32) -> (i32, i32) {
    %c0_i32 = arith.constant 0 : i32
    %c0_i32_0 = arith.constant 0 : i32
    %c0_i32_1 = arith.constant 0 : i32
    return %c0_i32, %c0_i32_0 : i32, i32
  }
  func.func @transform_2(%arg0: i32) -> (i32, i32) {
    %c0_i32 = arith.constant 0 : i32
    %c0_i32_0 = arith.constant 0 : i32
    %c0_i32_1 = arith.constant 0 : i32
    return %c0_i32, %c0_i32_0 : i32, i32
  }
  func.func @transform_3(%arg0: i32) -> (i32, i32) {
    %c0_i32 = arith.constant 0 : i32
    %c0_i32_0 = arith.constant 0 : i32
    %c0_i32_1 = arith.constant 0 : i32
    return %c0_i32, %c0_i32_0 : i32, i32
  }
  func.func @transform_4(%arg0: i32) -> (i32, i32) {
    %c0_i32 = arith.constant 0 : i32
    %c0_i32_0 = arith.constant 0 : i32
    %c0_i32_1 = arith.constant 0 : i32
    return %c0_i32, %c0_i32_0 : i32, i32
  }
  func.func @transform_5(%arg0: i32) -> (i32, i32) {
    %c0_i32 = arith.constant 0 : i32
    %c0_i32_0 = arith.constant 0 : i32
    %c0_i32_1 = arith.constant 0 : i32
    return %c0_i32, %c0_i32_0 : i32, i32
  }
  func.func @transform_6(%arg0: i32) -> (i32, i32) {
    %c0_i32 = arith.constant 0 : i32
    %c0_i32_0 = arith.constant 0 : i32
    %c0_i32_1 = arith.constant 0 : i32
    return %c0_i32, %c0_i32_0 : i32, i32
  }
  func.func @transform_7(%arg0: i32) -> (i32, i32) {
    %c0_i32 = arith.constant 0 : i32
    %c0_i32_0 = arith.constant 0 : i32
    %c0_i32_1 = arith.constant 0 : i32
    return %c0_i32, %c0_i32_0 : i32, i32
  }
  func.func @transform_8(%arg0: i32) -> (i32, i32) {
    %c0_i32 = arith.constant 0 : i32
    %c0_i32_0 = arith.constant 0 : i32
    %c0_i32_1 = arith.constant 0 : i32
    return %c0_i32, %c0_i32_0 : i32, i32
  }
  func.func @transform_9(%arg0: i32) -> (i32, i32) {
    %c0_i32 = arith.constant 0 : i32
    %c0_i32_0 = arith.constant 0 : i32
    return %arg0, %c0_i32 : i32, i32
  }
}

</mosaic_0001>

<bundles_post_ra>
// kernel: rnn_forward.1
= control target key start
LH: loop header
LB: loop body
LE: loop exit
PB: predicated region body
PF: predicated region fallthrough
CT: control target
= control target key end

     0   :  { %v673_v33 = vmov 0.0   ;;  %s1354_s1 = inlined_call_operand.vmem [shape: f32[128,128], index: 1, kind: input, shape index: {}]   ;;  %s1355_s2 = inlined_call_operand.vmem [shape: f32[128,128], index: 2, kind: input, shape index: {}]   ;;  %s1356_s3 = inlined_call_operand.vmem [shape: f32[1,128], index: 3, kind: input, shape index: {}]   ;;  %s1357_s0 = inlined_call_operand.vmem [shape: f32[8,8,128], index: 0, kind: input, shape index: {}]   ;;  %s1358_s4 = inlined_call_operand.vmem [shape: f32[128,128], index: 4, kind: input, shape index: {}]   ;;  %s1359_s5 = inlined_call_operand.vmem [shape: f32[128,128], index: 5, kind: input, shape index: {}]   ;;  %s1360_s6 = inlined_call_operand.vmem [shape: f32[1,128], index: 6, kind: input, shape index: {}]   ;;  %s1361_s7 = inlined_call_operand.vmem [shape: f32[128,128], index: 7, kind: input, shape index: {}]   ;;  %s1362_s8 = inlined_call_operand.vmem [shape: f32[1,128], index: 8, kind: input, shape index: {}]   ;;  %s1363_s9 = inlined_call_operand.vmem [shape: f32[8,128], index: 9, kind: output, shape index: {}]  }
   0x1   :  { %v47_v0 = vld [vmem:[%s1354_s1 + $0x78] sm:$0xff]  ;;  %v46_v1 = vld [vmem:[%s1354_s1 + $0x70] sm:$0xff]  ;;  %v45_v4 = vld [vmem:[%s1354_s1 + $0x68] sm:$0xff] }
   0x2   :  { %v733_v2 = vld [vmem:[%s1355_s2 + $0x78] sm:$0xff]  ;;  %76 = vmatpush.msra.mxu0 %v47_v0  ;;  %v739_v3 = vld [vmem:[%s1355_s2 + $0x70] sm:$0xff]  ;;  %v747_v5 = vld [vmem:[%s1355_s2 + $0x68] sm:$0xff] }
   0x3   :  { %126 = vmatpush.msra.mxu1 %v733_v2  ;;  %150 = vmatpush.msra.mxu2 %v733_v2  ;;  %v44_v6 = vld [vmem:[%s1354_s1 + $0x60] sm:$0xff]  ;;  %v43_v8 = vld [vmem:[%s1354_s1 + $0x58] sm:$0xff]  ;;  %v42_v10 = vld [vmem:[%s1354_s1 + $0x50] sm:$0xff] }
   0x4   :  { %175 = vmatpush.msra.mxu3 %v733_v2  ;;  %77 = vmatpush.msra.mxu0 %v46_v1  ;;  %v758_v7 = vld [vmem:[%s1355_s2 + $0x60] sm:$0xff]  ;;  %v769_v9 = vld [vmem:[%s1355_s2 + $0x58] sm:$0xff]  ;;  %v780_v11 = vld [vmem:[%s1355_s2 + $0x50] sm:$0xff] }
   0x5   :  { %127 = vmatpush.msra.mxu1 %v739_v3  ;;  %151 = vmatpush.msra.mxu2 %v739_v3  ;;  %v41_v12 = vld [vmem:[%s1354_s1 + $0x48] sm:$0xff]  ;;  %v40_v14 = vld [vmem:[%s1354_s1 + $0x40] sm:$0xff]  ;;  %v39_v16 = vld [vmem:[%s1354_s1 + $0x38] sm:$0xff] }
   0x6   :  { %176 = vmatpush.msra.mxu3 %v739_v3  ;;  %78 = vmatpush.msra.mxu0 %v45_v4  ;;  %v791_v13 = vld [vmem:[%s1355_s2 + $0x48] sm:$0xff]  ;;  %v802_v15 = vld [vmem:[%s1355_s2 + $0x40] sm:$0xff]  ;;  %v813_v17 = vld [vmem:[%s1355_s2 + $0x38] sm:$0xff] }
   0x7   :  { %128 = vmatpush.msra.mxu1 %v747_v5  ;;  %152 = vmatpush.msra.mxu2 %v747_v5  ;;  %v38_v18 = vld [vmem:[%s1354_s1 + $0x30] sm:$0xff]  ;;  %v37_v20 = vld [vmem:[%s1354_s1 + $0x28] sm:$0xff]  ;;  %v36_v22 = vld [vmem:[%s1354_s1 + $0x20] sm:$0xff] }
   0x8   :  { %177 = vmatpush.msra.mxu3 %v747_v5  ;;  %79 = vmatpush.msra.mxu0 %v44_v6  ;;  %v824_v19 = vld [vmem:[%s1355_s2 + $0x30] sm:$0xff]  ;;  %v835_v21 = vld [vmem:[%s1355_s2 + $0x28] sm:$0xff]  ;;  %v846_v23 = vld [vmem:[%s1355_s2 + $0x20] sm:$0xff] }
   0x9   :  { %129 = vmatpush.msra.mxu1 %v758_v7  ;;  %153 = vmatpush.msra.mxu2 %v758_v7  ;;  %v35_v24 = vld [vmem:[%s1354_s1 + $0x18] sm:$0xff]  ;;  %v34_v26 = vld [vmem:[%s1354_s1 + $0x10] sm:$0xff]  ;;  %v33_v28 = vld [vmem:[%s1354_s1 + $0x8] sm:$0xff] }
   0xa   :  { %178 = vmatpush.msra.mxu3 %v758_v7  ;;  %80 = vmatpush.msra.mxu0 %v43_v8  ;;  %v857_v25 = vld [vmem:[%s1355_s2 + $0x18] sm:$0xff]  ;;  %v868_v27 = vld [vmem:[%s1355_s2 + $0x10] sm:$0xff]  ;;  %v879_v29 = vld [vmem:[%s1355_s2 + $0x8] sm:$0xff] }
   0xb   :  { %130 = vmatpush.msra.mxu1 %v769_v9  ;;  %154 = vmatpush.msra.mxu2 %v769_v9  ;;  %v32_v30 = vld [vmem:[%s1354_s1] sm:$0xff]  ;;  %v66_v34 = vld [vmem:[%s1357_s0 + $0x8] sm:$0xff]  ;;  %v67_v41 = vld [vmem:[%s1357_s0 + $0x10] sm:$0xff] }
   0xc   :  { %179 = vmatpush.msra.mxu3 %v769_v9  ;;  %81 = vmatpush.msra.mxu0 %v42_v10  ;;  %v890_v31 = vld [vmem:[%s1355_s2] sm:$0xff]  ;;  %v68_v47 = vld [vmem:[%s1357_s0 + $0x18] sm:$0xff]  ;;  %v337_v49 = vld [vmem:[%s1358_s4 + $0x70] sm:$0xff] }
   0xd   :  { %131 = vmatpush.msra.mxu1 %v780_v11  ;;  %155 = vmatpush.msra.mxu2 %v780_v11  ;;  %v65_v32 = vld [vmem:[%s1357_s0] sm:$0xff]  ;;  %v338_v48 = vld [vmem:[%s1358_s4 + $0x78] sm:$0xff]  ;;  %v336_v50 = vld [vmem:[%s1358_s4 + $0x68] sm:$0xff] }
   0xe   :  { %180 = vmatpush.msra.mxu3 %v780_v11  ;;  %82 = vmatpush.msra.mxu0 %v41_v12  ;;  %v990_v35 = vld [vmem:[%s1356_s3] ss:$0 sm:$0xff]  ;;  %v334_v52 = vld [vmem:[%s1358_s4 + $0x58] sm:$0xff]  ;;  %v333_v53 = vld [vmem:[%s1358_s4 + $0x50] sm:$0xff] }
   0xf   :  { %132 = vmatpush.msra.mxu1 %v791_v13  ;;  %156 = vmatpush.msra.mxu2 %v791_v13  ;;  %v335_v51 = vld [vmem:[%s1358_s4 + $0x60] sm:$0xff]  ;;  %v332_v59 = vld [vmem:[%s1358_s4 + $0x48] sm:$0xff]  ;;  %v330_v61 = vld [vmem:[%s1358_s4 + $0x38] sm:$0xff] }
  0x10   :  { %181 = vmatpush.msra.mxu3 %v791_v13  ;;  %83 = vmatpush.msra.mxu0 %v40_v14  ;;  %v331_v60 = vld [vmem:[%s1358_s4 + $0x40] sm:$0xff]  ;;  %v329_v62 = vld [vmem:[%s1358_s4 + $0x30] sm:$0xff]  ;;  %v328_v63 = vld [vmem:[%s1358_s4 + $0x28] sm:$0xff] }
  0x11   :  { %133 = vmatpush.msra.mxu1 %v802_v15  ;;  %157 = vmatpush.msra.mxu2 %v802_v15  ;;  %v327_v0 = vld [vmem:[%s1358_s4 + $0x20] sm:$0xff]  ;;  %v326_v1 = vld [vmem:[%s1358_s4 + $0x18] sm:$0xff]  ;;  %v324_v4 = vld [vmem:[%s1358_s4 + $0x8] sm:$0xff] }
  0x12   :  { %182 = vmatpush.msra.mxu3 %v802_v15  ;;  %84 = vmatpush.msra.mxu0 %v39_v16  ;;  %v1070_v12 = vld [vmem:[%s1359_s5 + $0x70] sm:$0xff]  ;;  %v1086_v14 = vld [vmem:[%s1359_s5 + $0x60] sm:$0xff] }
  0x13   :  { %134 = vmatpush.msra.mxu1 %v813_v17  ;;  %158 = vmatpush.msra.mxu2 %v813_v17  ;;  %v1105_v16 = vld [vmem:[%s1359_s5 + $0x50] sm:$0xff] }
  0x14   :  { %183 = vmatpush.msra.mxu3 %v813_v17  ;;  %85 = vmatpush.msra.mxu0 %v38_v18  ;;  %v1131_v18 = vld [vmem:[%s1359_s5 + $0x40] sm:$0xff] }
  0x15   :  { %135 = vmatpush.msra.mxu1 %v824_v19  ;;  %159 = vmatpush.msra.mxu2 %v824_v19 }
  0x16   :  { %184 = vmatpush.msra.mxu3 %v824_v19  ;;  %86 = vmatpush.msra.mxu0 %v37_v20  ;;  %v1146_v20 = vld [vmem:[%s1359_s5 + $0x30] sm:$0xff] }
  0x17   :  { %136 = vmatpush.msra.mxu1 %v835_v21  ;;  %160 = vmatpush.msra.mxu2 %v835_v21 }
  0x18   :  { %185 = vmatpush.msra.mxu3 %v835_v21  ;;  %87 = vmatpush.msra.mxu0 %v36_v22  ;;  %v1165_v22 = vld [vmem:[%s1359_s5 + $0x20] sm:$0xff] }
  0x19   :  { %137 = vmatpush.msra.mxu1 %v846_v23  ;;  %161 = vmatpush.msra.mxu2 %v846_v23 }
  0x1a   :  { %186 = vmatpush.msra.mxu3 %v846_v23  ;;  %88 = vmatpush.msra.mxu0 %v35_v24  ;;  %v1179_v24 = vld [vmem:[%s1359_s5 + $0x10] sm:$0xff] }
  0x1b   :  { %138 = vmatpush.msra.mxu1 %v857_v25  ;;  %162 = vmatpush.msra.mxu2 %v857_v25 }
  0x1c   :  { %187 = vmatpush.msra.mxu3 %v857_v25  ;;  %89 = vmatpush.msra.mxu0 %v34_v26  ;;  %v1190_v26 = vld [vmem:[%s1359_s5 + $0x8] sm:$0xff] }
  0x1d   :  { %139 = vmatpush.msra.mxu1 %v868_v27  ;;  %163 = vmatpush.msra.mxu2 %v868_v27 }
  0x1e   :  { %188 = vmatpush.msra.mxu3 %v868_v27  ;;  %90 = vmatpush.msra.mxu0 %v33_v28 }
  0x1f   :  { %140 = vmatpush.msra.mxu1 %v879_v29  ;;  %164 = vmatpush.msra.mxu2 %v879_v29 }
  0x20   :  { %189 = vmatpush.msra.mxu3 %v879_v29  ;;  %91 = vmatpush.msra.mxu0 %v32_v30 }
  0x21   :  { %141 = vmatpush.msra.mxu1 %v890_v31  ;;  %92 = vmatmul.f32.vlgmr.msra.gmra.mxu0 %v65_v32  ;;  %v71_v32 = vld [vmem:[%s1357_s0 + $0x30] sm:$0xff] }
  0x22   :  { %142 = vmatmul.f32.vlgmr.msra.gmra.mxu1 %v673_v33  ;;  %165 = vmatpush.msra.mxu2 %v890_v31 }
  0x23   :  { %190 = vmatpush.msra.mxu3 %v890_v31  ;;  %200 = vmatpush.msrb.mxu1 %v733_v2 }
  0x24   :  { %225 = vmatpush.msrb.mxu2 %v733_v2  ;;  %275 = vmatpush.msrb.mxu0 %v733_v2 }
  0x25   :  { %250 = vmatpush.msrb.mxu3 %v733_v2  ;;  %201 = vmatpush.msrb.mxu1 %v739_v3 }
  0x26   :  { %226 = vmatpush.msrb.mxu2 %v739_v3  ;;  %276 = vmatpush.msrb.mxu0 %v739_v3 }
  0x27   :  { %251 = vmatpush.msrb.mxu3 %v739_v3  ;;  %202 = vmatpush.msrb.mxu1 %v747_v5 }
  0x28   :  { %227 = vmatpush.msrb.mxu2 %v747_v5  ;;  %277 = vmatpush.msrb.mxu0 %v747_v5 }
  0x29   :  { %252 = vmatpush.msrb.mxu3 %v747_v5  ;;  %203 = vmatpush.msrb.mxu1 %v758_v7 }
  0x2a   :  { %228 = vmatpush.msrb.mxu2 %v758_v7  ;;  %278 = vmatpush.msrb.mxu0 %v758_v7 }
  0x2b   :  { %253 = vmatpush.msrb.mxu3 %v758_v7  ;;  %204 = vmatpush.msrb.mxu1 %v769_v9 }
  0x2c   :  { %229 = vmatpush.msrb.mxu2 %v769_v9  ;;  %279 = vmatpush.msrb.mxu0 %v769_v9 }
  0x2d   :  { %254 = vmatpush.msrb.mxu3 %v769_v9  ;;  %205 = vmatpush.msrb.mxu1 %v780_v11 }
  0x2e   :  { %230 = vmatpush.msrb.mxu2 %v780_v11  ;;  %280 = vmatpush.msrb.mxu0 %v780_v11 }
  0x2f   :  { %255 = vmatpush.msrb.mxu3 %v780_v11  ;;  %206 = vmatpush.msrb.mxu1 %v791_v13 }
  0x30   :  { %231 = vmatpush.msrb.mxu2 %v791_v13  ;;  %281 = vmatpush.msrb.mxu0 %v791_v13 }
  0x31   :  { %256 = vmatpush.msrb.mxu3 %v791_v13  ;;  %207 = vmatpush.msrb.mxu1 %v802_v15 }
  0x32   :  { %232 = vmatpush.msrb.mxu2 %v802_v15  ;;  %282 = vmatpush.msrb.mxu0 %v802_v15 }
  0x33   :  { %257 = vmatpush.msrb.mxu3 %v802_v15  ;;  %208 = vmatpush.msrb.mxu1 %v813_v17 }
  0x34   :  { %233 = vmatpush.msrb.mxu2 %v813_v17  ;;  %283 = vmatpush.msrb.mxu0 %v813_v17 }
  0x35   :  { %258 = vmatpush.msrb.mxu3 %v813_v17  ;;  %209 = vmatpush.msrb.mxu1 %v824_v19 }
  0x36   :  { %234 = vmatpush.msrb.mxu2 %v824_v19  ;;  %284 = vmatpush.msrb.mxu0 %v824_v19 }
  0x37   :  { %259 = vmatpush.msrb.mxu3 %v824_v19  ;;  %210 = vmatpush.msrb.mxu1 %v835_v21 }
  0x38   :  { %235 = vmatpush.msrb.mxu2 %v835_v21  ;;  %285 = vmatpush.msrb.mxu0 %v835_v21 }
  0x39   :  { %260 = vmatpush.msrb.mxu3 %v835_v21  ;;  %211 = vmatpush.msrb.mxu1 %v846_v23 }
  0x3a   :  { %236 = vmatpush.msrb.mxu2 %v846_v23  ;;  %286 = vmatpush.msrb.mxu0 %v846_v23 }
  0x3b   :  { %261 = vmatpush.msrb.mxu3 %v846_v23  ;;  %212 = vmatpush.msrb.mxu1 %v857_v25 }
  0x3c   :  { %237 = vmatpush.msrb.mxu2 %v857_v25  ;;  %287 = vmatpush.msrb.mxu0 %v857_v25 }
  0x3d   :  { %262 = vmatpush.msrb.mxu3 %v857_v25  ;;  %213 = vmatpush.msrb.mxu1 %v868_v27 }
  0x3e   :  { %238 = vmatpush.msrb.mxu2 %v868_v27  ;;  %288 = vmatpush.msrb.mxu0 %v868_v27 }
  0x3f   :  { %263 = vmatpush.msrb.mxu3 %v868_v27  ;;  %214 = vmatpush.msrb.mxu1 %v879_v29 }
  0x40   :  { %239 = vmatpush.msrb.mxu2 %v879_v29  ;;  %289 = vmatpush.msrb.mxu0 %v879_v29 }
  0x41   :  { %264 = vmatpush.msrb.mxu3 %v879_v29  ;;  %215 = vmatpush.msrb.mxu1 %v890_v31 }
  0x42   :  { %240 = vmatpush.msrb.mxu2 %v890_v31  ;;  %290 = vmatpush.msrb.mxu0 %v890_v31 }
  0x43   :  { %265 = vmatpush.msrb.mxu3 %v890_v31  ;;  %300 = vmatpush.msra.mxu1 %v733_v2  ;;  %v325_v2 = vld [vmem:[%s1358_s4 + $0x10] sm:$0xff] }
  0x44   :  { %95 = vmatmul.f32.gmra.mxu0 %v66_v34 }
  0x45   :  { %301 = vmatpush.msra.mxu1 %v739_v3  ;;  %v69_v3 = vld [vmem:[%s1357_s0 + $0x20] sm:$0xff] }
  0x47   :  { %302 = vmatpush.msra.mxu1 %v747_v5  ;;  %v323_v5 = vld [vmem:[%s1358_s4] sm:$0xff] }
  0x49   :  { %303 = vmatpush.msra.mxu1 %v758_v7 }
  0x4b   :  { %304 = vmatpush.msra.mxu1 %v769_v9 }
  0x4c   :  { %98 = vmatmul.f32.gmra.mxu0 %v67_v41 }
  0x4d   :  { %305 = vmatpush.msra.mxu1 %v780_v11  ;;  %v1065_v11 = vld [vmem:[%s1359_s5 + $0x78] sm:$0xff] }
  0x4e   :  { %439 = vmatpush.msra.mxu0 %v1065_v11 }
  0x4f   :  { %306 = vmatpush.msra.mxu1 %v791_v13  ;;  %v1077_v13 = vld [vmem:[%s1359_s5 + $0x68] sm:$0xff] }
  0x50   :  { %440 = vmatpush.msra.mxu0 %v1070_v12 }
  0x51   :  { %307 = vmatpush.msra.mxu1 %v802_v15  ;;  %v1095_v15 = vld [vmem:[%s1359_s5 + $0x58] sm:$0xff] }
  0x52   :  { %441 = vmatpush.msra.mxu0 %v1077_v13 }
  0x53   :  { %308 = vmatpush.msra.mxu1 %v813_v17  ;;  %v1122_v17 = vld [vmem:[%s1359_s5 + $0x48] sm:$0xff] }
  0x54   :  { %101 = vmatmul.f32.gmra.mxu0 %v68_v47 }
  0x55   :  { %309 = vmatpush.msra.mxu1 %v824_v19  ;;  %442 = vmatpush.msra.mxu0 %v1086_v14  ;;  %v1138_v19 = vld [vmem:[%s1359_s5 + $0x38] sm:$0xff] }
  0x57   :  { %310 = vmatpush.msra.mxu1 %v835_v21  ;;  %443 = vmatpush.msra.mxu0 %v1095_v15  ;;  %v1152_v21 = vld [vmem:[%s1359_s5 + $0x28] sm:$0xff] }
  0x59   :  { %311 = vmatpush.msra.mxu1 %v846_v23  ;;  %444 = vmatpush.msra.mxu0 %v1105_v16  ;;  %v1174_v23 = vld [vmem:[%s1359_s5 + $0x18] sm:$0xff] }
  0x5b   :  { %312 = vmatpush.msra.mxu1 %v857_v25  ;;  %445 = vmatpush.msra.mxu0 %v1122_v17  ;;  %v70_v25 = vld [vmem:[%s1357_s0 + $0x28] sm:$0xff] }
  0x5c   :  { %104 = vmatmul.f32.gmra.mxu0 %v69_v3 }
  0x5d   :  { %313 = vmatpush.msra.mxu1 %v868_v27  ;;  %446 = vmatpush.msra.mxu0 %v1131_v18  ;;  %v1203_v27 = vld [vmem:[%s1359_s5] sm:$0xff] }
  0x5f   :  { %314 = vmatpush.msra.mxu1 %v879_v29  ;;  %447 = vmatpush.msra.mxu0 %v1138_v19 }
  0x61   :  { %315 = vmatpush.msra.mxu1 %v890_v31  ;;  %448 = vmatpush.msra.mxu0 %v1146_v20 }
  0x63   :  { %449 = vmatpush.msra.mxu0 %v1152_v21 }
  0x64   :  { %107 = vmatmul.f32.gmra.mxu0 %v70_v25  ;;  %v600_v25 = vld [vmem:[%s1361_s7 + $0x40] sm:$0xff] }
  0x65   :  { %450 = vmatpush.msra.mxu0 %v1165_v22 }
  0x67   :  { %451 = vmatpush.msra.mxu0 %v1174_v23 }
  0x69   :  { %452 = vmatpush.msra.mxu0 %v1179_v24 }
  0x6b   :  { %453 = vmatpush.msra.mxu0 %v1190_v26 }
  0x6c   :  { %110 = vmatmul.f32.gmra.mxu0 %v71_v32 }
  0x6d   :  { %454 = vmatpush.msra.mxu0 %v1203_v27 }
  0x9e   :  { %v93_v36 = vpop.f32.mrf.mxu0 }
  0x9f   :  { %v143_v37 = vpop.f32.mrf.mxu1  ;;  %v94_v38 = vadd.f32 %v990_v35, %v93_v36 }
  0xa1   :  { %v144_v39 = vadd.f32 %v143_v37, %v94_v38 }
  0xa3   :  { %641 = vtanh.f32 %v144_v39 }
  0xa9   :  { %v993_v40 = vpop.eup %641 }
  0xaa   :  { %166 = vmatmul.f32.vlgmr.msra.gmra.mxu2 %v993_v40 }
  0xab   :  { %367 = vmatpush.msra.mxu2 %v338_v48 }
  0xad   :  { %368 = vmatpush.msra.mxu2 %v337_v49 }
  0xaf   :  { %369 = vmatpush.msra.mxu2 %v336_v50 }
  0xb1   :  { %370 = vmatpush.msra.mxu2 %v335_v51 }
  0xb3   :  { %371 = vmatpush.msra.mxu2 %v334_v52 }
  0xb5   :  { %372 = vmatpush.msra.mxu2 %v333_v53 }
  0xb7   :  { %373 = vmatpush.msra.mxu2 %v332_v59 }
  0xb9   :  { %374 = vmatpush.msra.mxu2 %v331_v60 }
  0xbb   :  { %375 = vmatpush.msra.mxu2 %v330_v61 }
  0xbd   :  { %376 = vmatpush.msra.mxu2 %v329_v62 }
  0xbf   :  { %377 = vmatpush.msra.mxu2 %v328_v63 }
  0xc1   :  { %v96_v42 = vpop.f32.mrf.mxu0  ;;  %378 = vmatpush.msra.mxu2 %v327_v0 }
  0xc2   :  { %v97_v43 = vadd.f32 %v990_v35, %v96_v42 }
  0xc3   :  { %379 = vmatpush.msra.mxu2 %v326_v1 }
  0xc5   :  { %380 = vmatpush.msra.mxu2 %v325_v2 }
  0xc7   :  { %381 = vmatpush.msra.mxu2 %v324_v4 }
  0xc9   :  { %v99_v54 = vpop.f32.mrf.mxu0  ;;  %382 = vmatpush.msra.mxu2 %v323_v5 }
  0xca   :  { %v100_v55 = vadd.f32 %v990_v35, %v99_v54 }
  0xd1   :  { %v102_v6 = vpop.f32.mrf.mxu0 }
  0xd2   :  { %v103_v7 = vadd.f32 %v990_v35, %v102_v6 }
  0xd9   :  { %v105_v28 = vpop.f32.mrf.mxu0 }
  0xda   :  { %v106_v29 = vadd.f32 %v990_v35, %v105_v28  ;;  %v598_v28 = vld [vmem:[%s1361_s7 + $0x30] sm:$0xff] }
  0xe1   :  { %v108_v36 = vpop.f32.mrf.mxu0 }
  0xe2   :  { %v109_v37 = vadd.f32 %v990_v35, %v108_v36  ;;  %v595_v36 = vld [vmem:[%s1361_s7 + $0x18] sm:$0xff] }
  0xe9   :  { %v111_v47 = vpop.f32.mrf.mxu0 }
  0xea   :  { %v112_v49 = vadd.f32 %v990_v35, %v111_v47 }
 0x12d   :  { %v167_v44 = vpop.f32.mrf.mxu2 }
 0x12e   :  { %v168_v45 = vadd.f32 %v167_v44, %v97_v43 }
 0x130   :  { %643 = vtanh.f32 %v168_v45 }
 0x136   :  { %v1000_v46 = vpop.eup %643 }
 0x137   :  { %191 = vmatmul.f32.vlgmr.msra.gmra.mxu3 %v1000_v46 }
 0x138   :  { %417 = vmatpush.msra.mxu3 %v1065_v11 }
 0x13a   :  { %418 = vmatpush.msra.mxu3 %v1070_v12 }
 0x13c   :  { %419 = vmatpush.msra.mxu3 %v1077_v13 }
 0x13e   :  { %420 = vmatpush.msra.mxu3 %v1086_v14 }
 0x140   :  { %421 = vmatpush.msra.mxu3 %v1095_v15 }
 0x142   :  { %422 = vmatpush.msra.mxu3 %v1105_v16 }
 0x144   :  { %423 = vmatpush.msra.mxu3 %v1122_v17 }
 0x146   :  { %424 = vmatpush.msra.mxu3 %v1131_v18 }
 0x148   :  { %425 = vmatpush.msra.mxu3 %v1138_v19 }
 0x14a   :  { %426 = vmatpush.msra.mxu3 %v1146_v20 }
 0x14c   :  { %427 = vmatpush.msra.mxu3 %v1152_v21 }
 0x14e   :  { %428 = vmatpush.msra.mxu3 %v1165_v22 }
 0x150   :  { %429 = vmatpush.msra.mxu3 %v1174_v23 }
 0x152   :  { %430 = vmatpush.msra.mxu3 %v1179_v24 }
 0x154   :  { %431 = vmatpush.msra.mxu3 %v1190_v26 }
 0x156   :  { %432 = vmatpush.msra.mxu3 %v1203_v27 }
 0x1ba   :  { %v192_v56 = vpop.f32.mrf.mxu3 }
 0x1bb   :  { %v193_v57 = vadd.f32 %v192_v56, %v100_v55 }
 0x1bd   :  { %645 = vtanh.f32 %v193_v57 }
 0x1c3   :  { %v1025_v58 = vpop.eup %645 }
 0x1c4   :  { %216 = vmatmul.f32.vlgmr.msrb.gmra.mxu1 %v1025_v58 }
 0x1c5   :  { %461 = vmatpush.msrb.mxu1 %v1065_v11 }
 0x1c7   :  { %462 = vmatpush.msrb.mxu1 %v1070_v12 }
 0x1c9   :  { %463 = vmatpush.msrb.mxu1 %v1077_v13 }
 0x1cb   :  { %464 = vmatpush.msrb.mxu1 %v1086_v14 }
 0x1cd   :  { %465 = vmatpush.msrb.mxu1 %v1095_v15 }
 0x1cf   :  { %466 = vmatpush.msrb.mxu1 %v1105_v16 }
 0x1d1   :  { %467 = vmatpush.msrb.mxu1 %v1122_v17 }
 0x1d3   :  { %468 = vmatpush.msrb.mxu1 %v1131_v18 }
 0x1d5   :  { %469 = vmatpush.msrb.mxu1 %v1138_v19 }
 0x1d7   :  { %470 = vmatpush.msrb.mxu1 %v1146_v20 }
 0x1d9   :  { %471 = vmatpush.msrb.mxu1 %v1152_v21 }
 0x1db   :  { %472 = vmatpush.msrb.mxu1 %v1165_v22 }
 0x1dd   :  { %473 = vmatpush.msrb.mxu1 %v1174_v23 }
 0x1df   :  { %474 = vmatpush.msrb.mxu1 %v1179_v24 }
 0x1e1   :  { %475 = vmatpush.msrb.mxu1 %v1190_v26 }
 0x1e3   :  { %476 = vmatpush.msrb.mxu1 %v1203_v27 }
 0x241   :  { %v217_v8 = vpop.f32.mrf.mxu1 }
 0x242   :  { %v218_v9 = vadd.f32 %v217_v8, %v103_v7 }
 0x244   :  { %647 = vtanh.f32 %v218_v9 }
 0x24a   :  { %v648_v10 = vpop.eup %647 }
 0x24b   :  { %241 = vmatmul.f32.vlgmr.msrb.gmra.mxu2 %v648_v10 }
 0x24c   :  { %549 = vmatpush.msrb.mxu2 %v1065_v11 }
 0x24e   :  { %550 = vmatpush.msrb.mxu2 %v1070_v12 }
 0x250   :  { %551 = vmatpush.msrb.mxu2 %v1077_v13 }
 0x252   :  { %552 = vmatpush.msrb.mxu2 %v1086_v14 }
 0x253   :  { %383 = vmatmul.f32.vlgmr.msra.gmra.mxu2 %v993_v40  ;;  %v1256_v40 = vld [vmem:[%s1360_s6] ss:$0 sm:$0xff] }
 0x254   :  { %553 = vmatpush.msrb.mxu2 %v1095_v15 }
 0x256   :  { %554 = vmatpush.msrb.mxu2 %v1105_v16 }
 0x258   :  { %555 = vmatpush.msrb.mxu2 %v1122_v17 }
 0x25a   :  { %556 = vmatpush.msrb.mxu2 %v1131_v18 }
 0x25b   :  { %386 = vmatmul.f32.gmra.mxu2 %v1000_v46 }
 0x25c   :  { %557 = vmatpush.msrb.mxu2 %v1138_v19 }
 0x25e   :  { %558 = vmatpush.msrb.mxu2 %v1146_v20 }
 0x260   :  { %559 = vmatpush.msrb.mxu2 %v1152_v21 }
 0x262   :  { %560 = vmatpush.msrb.mxu2 %v1165_v22 }
 0x263   :  { %389 = vmatmul.f32.gmra.mxu2 %v1025_v58 }
 0x264   :  { %561 = vmatpush.msrb.mxu2 %v1174_v23 }
 0x266   :  { %562 = vmatpush.msrb.mxu2 %v1179_v24 }
 0x268   :  { %563 = vmatpush.msrb.mxu2 %v1190_v26 }
 0x26a   :  { %564 = vmatpush.msrb.mxu2 %v1203_v27 }
 0x26b   :  { %392 = vmatmul.f32.gmra.mxu2 %v648_v10 }
 0x2ce   :  { %v242_v30 = vpop.f32.mrf.mxu2 }
 0x2cf   :  { %v243_v31 = vadd.f32 %v242_v30, %v106_v29  ;;  %v597_v29 = vld [vmem:[%s1361_s7 + $0x28] sm:$0xff] }
 0x2d1   :  { %649 = vtanh.f32 %v243_v31 }
 0x2d6   :  { %v384_v41 = vpop.f32.mrf.mxu2 }
 0x2d7   :  { %v650_v34 = vpop.eup %649  ;;  %v385_v42 = vadd.f32 %v1256_v40, %v384_v41 }
 0x2d8   :  { %266 = vmatmul.f32.vlgmr.msrb.gmra.mxu3 %v650_v34  ;;  %395 = vmatmul.f32.gmra.mxu2 %v650_v34 }
 0x2d9   :  { %483 = vmatpush.msrb.mxu3 %v1065_v11 }
 0x2db   :  { %484 = vmatpush.msrb.mxu3 %v1070_v12 }
 0x2dd   :  { %485 = vmatpush.msrb.mxu3 %v1077_v13 }
 0x2de   :  { %v387_v52 = vpop.f32.mrf.mxu2 }
 0x2df   :  { %486 = vmatpush.msrb.mxu3 %v1086_v14  ;;  %v388_v53 = vadd.f32 %v1256_v40, %v387_v52 }
 0x2e0   :  { %433 = vmatmul.f32.vlgmr.msra.gmra.mxu3 %v673_v33  ;;  %v72_v33 = vld [vmem:[%s1357_s0 + $0x38] sm:$0xff] }
 0x2e1   :  { %487 = vmatpush.msrb.mxu3 %v1095_v15  ;;  %113 = vmatmul.f32.gmra.mxu0 %v72_v33  ;;  %v596_v33 = vld [vmem:[%s1361_s7 + $0x20] sm:$0xff] }
 0x2e3   :  { %488 = vmatpush.msrb.mxu3 %v1105_v16 }
 0x2e5   :  { %489 = vmatpush.msrb.mxu3 %v1122_v17 }
 0x2e6   :  { %v390_v61 = vpop.f32.mrf.mxu2 }
 0x2e7   :  { %490 = vmatpush.msrb.mxu3 %v1131_v18  ;;  %v391_v62 = vadd.f32 %v1256_v40, %v390_v61 }
 0x2e9   :  { %491 = vmatpush.msrb.mxu3 %v1138_v19 }
 0x2eb   :  { %492 = vmatpush.msrb.mxu3 %v1146_v20 }
 0x2ed   :  { %493 = vmatpush.msrb.mxu3 %v1152_v21 }
 0x2ee   :  { %v393_v3 = vpop.f32.mrf.mxu2 }
 0x2ef   :  { %494 = vmatpush.msrb.mxu3 %v1165_v22  ;;  %v394_v4 = vadd.f32 %v1256_v40, %v393_v3 }
 0x2f1   :  { %495 = vmatpush.msrb.mxu3 %v1174_v23 }
 0x2f3   :  { %496 = vmatpush.msrb.mxu3 %v1179_v24 }
 0x2f5   :  { %497 = vmatpush.msrb.mxu3 %v1190_v26 }
 0x2f7   :  { %498 = vmatpush.msrb.mxu3 %v1203_v27 }
 0x2f9   :  { %571 = vmatpush.msra.mxu3 %v1065_v11 }
 0x2fb   :  { %572 = vmatpush.msra.mxu3 %v1070_v12 }
 0x2fd   :  { %573 = vmatpush.msra.mxu3 %v1077_v13 }
 0x2ff   :  { %574 = vmatpush.msra.mxu3 %v1086_v14 }
 0x301   :  { %575 = vmatpush.msra.mxu3 %v1095_v15 }
 0x303   :  { %576 = vmatpush.msra.mxu3 %v1105_v16 }
 0x305   :  { %577 = vmatpush.msra.mxu3 %v1122_v17 }
 0x307   :  { %578 = vmatpush.msra.mxu3 %v1131_v18 }
 0x309   :  { %579 = vmatpush.msra.mxu3 %v1138_v19 }
 0x30b   :  { %580 = vmatpush.msra.mxu3 %v1146_v20 }
 0x30d   :  { %581 = vmatpush.msra.mxu3 %v1152_v21 }
 0x30f   :  { %582 = vmatpush.msra.mxu3 %v1165_v22 }
 0x311   :  { %583 = vmatpush.msra.mxu3 %v1174_v23 }
 0x313   :  { %584 = vmatpush.msra.mxu3 %v1179_v24 }
 0x315   :  { %585 = vmatpush.msra.mxu3 %v1190_v26 }
 0x317   :  { %586 = vmatpush.msra.mxu3 %v1203_v27 }
 0x35b   :  { %v267_v38 = vpop.f32.mrf.mxu3  ;;  %v396_v7 = vpop.f32.mrf.mxu2 }
 0x35c   :  { %v268_v39 = vadd.f32 %v267_v38, %v109_v37  ;;  %v397_v8 = vadd.f32 %v1256_v40, %v396_v7  ;;  %v594_v37 = vld [vmem:[%s1361_s7 + $0x10] sm:$0xff]  ;;  %v593_v38 = vld [vmem:[%s1361_s7 + $0x8] sm:$0xff] }
 0x35e   :  { %651 = vtanh.f32 %v268_v39  ;;  %v114_v48 = vpop.f32.mrf.mxu0  ;;  %v592_v39 = vld [vmem:[%s1361_s7] sm:$0xff] }
 0x35f   :  { %v115_v58 = vadd.f32 %v990_v35, %v114_v48 }
 0x363   :  { %v434_v43 = vpop.f32.mrf.mxu3 }
 0x364   :  { %v652_v44 = vpop.eup %651  ;;  %v435_v45 = vadd.f32 %v434_v43, %v385_v42 }
 0x365   :  { %291 = vmatmul.f32.vlgmr.msrb.gmra.mxu0 %v652_v44  ;;  %398 = vmatmul.f32.gmra.mxu2 %v652_v44 }
 0x366   :  { %653 = vtanh.f32 %v435_v45  ;;  %505 = vmatpush.msrb.mxu0 %v1065_v11  ;;  %v640_v45 = vld [vmem:[%s1362_s8] ss:$0 sm:$0xff] }
 0x368   :  { %506 = vmatpush.msrb.mxu0 %v1070_v12 }
 0x36a   :  { %507 = vmatpush.msrb.mxu0 %v1077_v13 }
 0x36c   :  { %v654_v46 = vpop.eup %653  ;;  %508 = vmatpush.msrb.mxu0 %v1086_v14 }
 0x36d   :  { %455 = vmatmul.f32.vlgmr.msra.gmra.mxu0 %v654_v46 }
 0x36e   :  { %509 = vmatpush.msrb.mxu0 %v1095_v15 }
 0x370   :  { %510 = vmatpush.msrb.mxu0 %v1105_v16 }
 0x372   :  { %511 = vmatpush.msrb.mxu0 %v1122_v17 }
 0x374   :  { %512 = vmatpush.msrb.mxu0 %v1131_v18 }
 0x376   :  { %513 = vmatpush.msrb.mxu0 %v1138_v19 }
 0x378   :  { %514 = vmatpush.msrb.mxu0 %v1146_v20 }
 0x37a   :  { %515 = vmatpush.msrb.mxu0 %v1152_v21 }
 0x37c   :  { %516 = vmatpush.msrb.mxu0 %v1165_v22 }
 0x37e   :  { %517 = vmatpush.msrb.mxu0 %v1174_v23 }
 0x380   :  { %518 = vmatpush.msrb.mxu0 %v1179_v24 }
 0x382   :  { %519 = vmatpush.msrb.mxu0 %v1190_v26 }
 0x384   :  { %520 = vmatpush.msrb.mxu0 %v1203_v27 }
 0x3e2   :  { %v292_v50 = vpop.f32.mrf.mxu0 }
 0x3e3   :  { %v293_v51 = vadd.f32 %v292_v50, %v112_v49 }
 0x3e5   :  { %655 = vtanh.f32 %v293_v51 }
 0x3ea   :  { %v456_v54 = vpop.f32.mrf.mxu0 }
 0x3eb   :  { %v656_v55 = vpop.eup %655  ;;  %v457_v56 = vadd.f32 %v456_v54, %v388_v53 }
 0x3ec   :  { %316 = vmatmul.f32.vlgmr.msra.gmra.mxu1 %v656_v55  ;;  %401 = vmatmul.f32.gmra.mxu2 %v656_v55 }
 0x3ed   :  { %657 = vtanh.f32 %v457_v56  ;;  %527 = vmatpush.msra.mxu1 %v1065_v11 }
 0x3ef   :  { %528 = vmatpush.msra.mxu1 %v1070_v12  ;;  %v399_v12 = vpop.f32.mrf.mxu2 }
 0x3f1   :  { %529 = vmatpush.msra.mxu1 %v1077_v13  ;;  %v400_v13 = vadd.f32 %v1256_v40, %v399_v12 }
 0x3f3   :  { %v658_v57 = vpop.eup %657  ;;  %530 = vmatpush.msra.mxu1 %v1086_v14 }
 0x3f4   :  { %477 = vmatmul.f32.vlgmr.msrb.gmra.mxu1 %v658_v57 }
 0x3f5   :  { %531 = vmatpush.msra.mxu1 %v1095_v15 }
 0x3f7   :  { %532 = vmatpush.msra.mxu1 %v1105_v16 }
 0x3f9   :  { %533 = vmatpush.msra.mxu1 %v1122_v17  ;;  %v607_v17 = vld [vmem:[%s1361_s7 + $0x78] sm:$0xff] }
 0x3fa   :  { %612 = vmatpush.msra.mxu0 %v607_v17 }
 0x3fb   :  { %534 = vmatpush.msra.mxu1 %v1131_v18  ;;  %v606_v18 = vld [vmem:[%s1361_s7 + $0x70] sm:$0xff] }
 0x3fc   :  { %613 = vmatpush.msra.mxu0 %v606_v18 }
 0x3fd   :  { %535 = vmatpush.msra.mxu1 %v1138_v19  ;;  %v605_v19 = vld [vmem:[%s1361_s7 + $0x68] sm:$0xff] }
 0x3fe   :  { %614 = vmatpush.msra.mxu0 %v605_v19 }
 0x3ff   :  { %536 = vmatpush.msra.mxu1 %v1146_v20  ;;  %v604_v20 = vld [vmem:[%s1361_s7 + $0x60] sm:$0xff] }
 0x400   :  { %615 = vmatpush.msra.mxu0 %v604_v20 }
 0x401   :  { %537 = vmatpush.msra.mxu1 %v1152_v21 }
 0x403   :  { %538 = vmatpush.msra.mxu1 %v1165_v22  ;;  %v603_v22 = vld [vmem:[%s1361_s7 + $0x58] sm:$0xff] }
 0x404   :  { %616 = vmatpush.msra.mxu0 %v603_v22 }
 0x405   :  { %539 = vmatpush.msra.mxu1 %v1174_v23  ;;  %v602_v23 = vld [vmem:[%s1361_s7 + $0x50] sm:$0xff] }
 0x406   :  { %617 = vmatpush.msra.mxu0 %v602_v23 }
 0x407   :  { %540 = vmatpush.msra.mxu1 %v1179_v24  ;;  %v601_v24 = vld [vmem:[%s1361_s7 + $0x48] sm:$0xff] }
 0x408   :  { %618 = vmatpush.msra.mxu0 %v601_v24 }
 0x409   :  { %541 = vmatpush.msra.mxu1 %v1190_v26 }
 0x40a   :  { %619 = vmatpush.msra.mxu0 %v600_v25 }
 0x40b   :  { %542 = vmatpush.msra.mxu1 %v1203_v27  ;;  %v599_v27 = vld [vmem:[%s1361_s7 + $0x38] sm:$0xff] }
 0x40c   :  { %620 = vmatpush.msra.mxu0 %v599_v27 }
 0x40e   :  { %621 = vmatpush.msra.mxu0 %v598_v28 }
 0x410   :  { %622 = vmatpush.msra.mxu0 %v597_v29 }
 0x412   :  { %623 = vmatpush.msra.mxu0 %v596_v33 }
 0x414   :  { %624 = vmatpush.msra.mxu0 %v595_v36 }
 0x416   :  { %625 = vmatpush.msra.mxu0 %v594_v37 }
 0x418   :  { %626 = vmatpush.msra.mxu0 %v593_v38 }
 0x41a   :  { %627 = vmatpush.msra.mxu0 %v592_v39 }
 0x469   :  { %v317_v59 = vpop.f32.mrf.mxu1 }
 0x46a   :  { %v318_v60 = vadd.f32 %v317_v59, %v115_v58 }
 0x46c   :  { %659 = vtanh.f32 %v318_v60 }
 0x46f   :  { %v402_v21 = vpop.f32.mrf.mxu2 }
 0x470   :  { %v403_v30 = vadd.f32 %v1256_v40, %v402_v21 }
 0x471   :  { %v478_v63 = vpop.f32.mrf.mxu1 }
 0x472   :  { %v660_v0 = vpop.eup %659  ;;  %v479_v1 = vadd.f32 %v478_v63, %v391_v62 }
 0x473   :  { %404 = vmatmul.f32.gmra.mxu2 %v660_v0 }
 0x474   :  { %661 = vtanh.f32 %v479_v1 }
 0x47a   :  { %v662_v2 = vpop.eup %661 }
 0x47b   :  { %499 = vmatmul.f32.vlgmr.msrb.gmra.mxu3 %v662_v2 }
 0x4f6   :  { %v405_v26 = vpop.f32.mrf.mxu2 }
 0x4f7   :  { %v406_v41 = vadd.f32 %v1256_v40, %v405_v26 }
 0x4fe   :  { %v500_v5 = vpop.f32.mrf.mxu3 }
 0x4ff   :  { %v501_v6 = vadd.f32 %v500_v5, %v394_v4 }
 0x501   :  { %663 = vtanh.f32 %v501_v6 }
 0x507   :  { %v664_v35 = vpop.eup %663 }
 0x508   :  { %521 = vmatmul.f32.vlgmr.msrb.gmra.mxu0 %v664_v35 }
 0x585   :  { %v522_v9 = vpop.f32.mrf.mxu0 }
 0x586   :  { %v523_v10 = vadd.f32 %v522_v9, %v397_v8 }
 0x588   :  { %665 = vtanh.f32 %v523_v10 }
 0x58e   :  { %v666_v11 = vpop.eup %665 }
 0x58f   :  { %543 = vmatmul.f32.vlgmr.msra.gmra.mxu1 %v666_v11 }
 0x60c   :  { %v544_v14 = vpop.f32.mrf.mxu1 }
 0x60d   :  { %v545_v15 = vadd.f32 %v544_v14, %v400_v13 }
 0x60f   :  { %667 = vtanh.f32 %v545_v15 }
 0x615   :  { %v668_v16 = vpop.eup %667 }
 0x616   :  { %565 = vmatmul.f32.vlgmr.msrb.gmra.mxu2 %v668_v16 }
 0x699   :  { %v566_v31 = vpop.f32.mrf.mxu2 }
 0x69a   :  { %v567_v32 = vadd.f32 %v566_v31, %v403_v30 }
 0x69c   :  { %669 = vtanh.f32 %v567_v32 }
 0x6a2   :  { %v670_v34 = vpop.eup %669 }
 0x6a3   :  { %587 = vmatmul.f32.vlgmr.msra.gmra.mxu3 %v670_v34 }
 0x726   :  { %v588_v42 = vpop.f32.mrf.mxu3 }
 0x727   :  { %v589_v43 = vadd.f32 %v588_v42, %v406_v41 }
 0x729   :  { %671 = vtanh.f32 %v589_v43 }
 0x72f   :  { %v672_v44 = vpop.eup %671 }
 0x730   :  { %628 = vmatmul.f32.vlgmr.msra.gmra.mxu0 %v672_v44 }
 0x7ad   :  { %v629_v46 = vpop.f32.mrf.mxu0 }
 0x7ae   :  { %v630_v47 = vadd.f32 %v640_v45, %v629_v46 }
 0x7b0   :  { %632 = vst [vmem:[%s1363_s9] sm:$0xff] %v630_v47 }

</bundles_post_ra>
